<compile_context>
chip_gen: v7x
topology: tpu7x:2x2x1
jax: 0.10.0
libtpu: 0.0.40
codegen_flags: <defaults>
</compile_context>

<pallas_src>
import functools

import jax
import jax.numpy as jnp
import numpy as np
from jax import lax
from jax.experimental import pallas as pl
from jax.experimental.pallas import tpu as pltpu

_NEG = -1e30  # finite "minus infinity" pad value: exp underflows to exactly 0


def _round_up(x, m):
    return ((x + m - 1) // m) * m


def _vmem_capacity_bytes():
    try:
        return int(pltpu.get_tpu_info().vmem_capacity_bytes)
    except Exception:
        return 64 << 20  # v7x floor -> safe bound on every generation


def _ace_kernel(logits_ref, tgt_ref, out_ref, acc_ref, *,
                T_total, tt, C_valid, inv_T):
    """Grid = (batch, time). Accumulates sum_t softmax(logits) for one batch
    row and emits that row's partial ACE loss on the last time step."""
    bi = pl.program_id(0)
    tj = pl.program_id(1)

    @pl.when(tj == 0)
    def _():
        acc_ref[...] = jnp.zeros_like(acc_ref)

    # (1, tt, C_pad) tile; numerically-stable softmax over the class lanes.
    x = logits_ref[...].astype(jnp.float32)
    m = jnp.max(x, axis=-1, keepdims=True)
    e = jnp.exp(x - m)
    s = jnp.sum(e, axis=-1, keepdims=True)          # (1, tt, 1)
    p = e * (1.0 / s)                               # per-row divide, not per-elem

    if T_total % tt != 0:                           # static: only if time padded
        row = lax.broadcasted_iota(jnp.int32, (1, tt, 1), 1)
        p = jnp.where(tj * tt + row < T_total, p, 0.0)

    acc_ref[...] += jnp.sum(p, axis=1)              # (1, C_pad): accumulate over T

    @pl.when(tj == pl.num_programs(1) - 1)
    def _():
        probs = acc_ref[...] * inv_T                # (1, C_pad)
        lane = lax.broadcasted_iota(jnp.int32, probs.shape, 1)
        # Padded class lanes have probs == 0 and counts == 0: guard log(0)*0.
        logp = jnp.log(jnp.where(lane < C_valid, probs, 1.0))
        tgt = tgt_ref[pl.ds(bi, 1), :]              # (1, C_pad), pre-scaled 1/(T*B)
        part = -jnp.sum(logp * tgt)
        out_ref[...] = jnp.broadcast_to(part, out_ref.shape)


def ace_loss_pallas(logits, targets, input_lengths, target_lengths, alpha=0.0):
    """ACE loss.  logits: (T, B, C) float32 or bfloat16; targets: flat int
    labels; target_lengths: host-side ints (numpy / list) of shape (B,).
    input_lengths is unused (kept for call-signature parity)."""
    del input_lengths  # unused by the reference forward as well
    T_, B, C = logits.shape

    # ---- glue: per-batch class counts (B, C) in plain JAX -------------------
    # target_lengths stay host-side (numpy) -> no device sync, static L_max.
    tl_host = np.asarray(target_lengths)
    L_max = int(tl_host.max())
    offsets = np.concatenate([[0], np.cumsum(tl_host)[:-1]]).astype(np.int32)
    pos = jnp.arange(L_max, dtype=jnp.int32)
    idx = jnp.asarray(offsets)[:, None] + pos[None, :]                 # (B, L_max)
    valid = pos[None, :] < jnp.asarray(tl_host)[:, None]
    idx = jnp.clip(idx, 0, targets.shape[0] - 1)
    padded = jnp.where(valid, targets[idx], 0)                         # pad value 0
    onehot = jax.nn.one_hot(padded, C, dtype=jnp.float32)              # (B, L_max, C)
    onehot = onehot * (1.0 - alpha) + alpha / C                        # label smoothing
    counts = jnp.sum(onehot, axis=1)                                   # (B, C)
    counts = counts.at[:, 0].set(
        jnp.float32(T_) - jnp.asarray(tl_host, jnp.float32))
    counts = counts / (float(T_) * float(B))       # fold /T and /B into counts

    # ---- layout & VMEM-aware tiling -----------------------------------------
    C_pad = _round_up(C, 128)
    elem_bytes = jnp.dtype(logits.dtype).itemsize
    vmem_cap = _vmem_capacity_bytes()
    budget = int(vmem_cap * 0.45)                  # for the double-buffered tile
    tt = budget // (2 * C_pad * elem_bytes)
    tt = max(8, min(tt, 1024, _round_up(T_, 8)))
    tt = (tt // 8) * 8                             # time tile: multiple of 8
    T_pad = _round_up(T_, tt)

    # (B, T, C): time on sublanes, classes on lanes; pad once (single XLA pass).
    x = jnp.transpose(logits, (1, 0, 2))
    if T_pad != T_ or C_pad != C:
        x = jnp.pad(x, ((0, 0), (0, T_pad - T_), (0, C_pad - C)),
                    constant_values=_NEG)
    if C_pad != C:
        counts = jnp.pad(counts, ((0, 0), (0, C_pad - C)))

    needed = (2 * tt * C_pad * elem_bytes          # double-buffered logits tile
              + 2 * B * C_pad * 4                  # counts
              + C_pad * 4                          # accumulator scratch
              + 4 * 128 * 4)                       # partial-loss output blocks
    vmem_limit = int(min(vmem_cap - (2 << 20),
                         max(32 << 20, needed + (8 << 20))))

    kernel = functools.partial(_ace_kernel, T_total=T_, tt=tt, C_valid=C,
                               inv_T=1.0 / float(T_))
    partial = pl.pallas_call(
        kernel,
        out_shape=jax.ShapeDtypeStruct((B, 1, 128), jnp.float32),
        grid_spec=pltpu.PrefetchScalarGridSpec(
            num_scalar_prefetch=0,
            grid=(B, T_pad // tt),
            in_specs=[
                pl.BlockSpec((1, tt, C_pad), lambda b, t: (b, t, 0)),
                pl.BlockSpec((B, C_pad), lambda b, t: (0, 0)),
            ],
            out_specs=pl.BlockSpec((1, 1, 128), lambda b, t: (b, 0, 0)),
            scratch_shapes=[pltpu.VMEM((1, C_pad), jnp.float32)],
        ),
        compiler_params=pltpu.CompilerParams(
            dimension_semantics=("parallel", "arbitrary"),
            vmem_limit_bytes=vmem_limit),
    )(x, counts)
    # tiny final combine over per-batch partial losses
    return jnp.sum(partial[:, 0, 0])


def ace_loss_ref(logits, targets, input_lengths, target_lengths, alpha=0.0):
    """Pure-JAX reference mirroring the PyTorch forward."""
    T_, B, C = logits.shape
    tl_host = np.asarray(target_lengths)
    L_max = int(tl_host.max())
    offsets = np.concatenate([[0], np.cumsum(tl_host)[:-1]]).astype(np.int32)
    pos = jnp.arange(L_max, dtype=jnp.int32)
    idx = jnp.asarray(offsets)[:, None] + pos[None, :]
    valid = pos[None, :] < jnp.asarray(tl_host)[:, None]
    idx = jnp.clip(idx, 0, targets.shape[0] - 1)
    padded = jnp.where(valid, targets[idx], 0)
    onehot = jax.nn.one_hot(padded, C, dtype=jnp.float32)
    onehot = onehot * (1.0 - alpha) + alpha / C
    counts = jnp.sum(onehot, axis=1)
    counts = counts.at[:, 0].set(T_ - jnp.asarray(tl_host, jnp.float32))
    probs = jax.nn.softmax(logits.astype(jnp.float32), axis=2)
    probs = jnp.sum(probs, axis=0) / T_
    counts = counts / T_
    return -jnp.sum(jnp.log(probs) * counts) / B


if __name__ == "__main__":
    key = jax.random.PRNGKey(0)
    T_, B, C = 16, 2, 8
    k1, k2 = jax.random.split(key)

    logits = jax.random.normal(k1, (T_, B, C), dtype=jnp.float32)
    target_lengths = np.array([5, 3], dtype=np.int32)   # host-side: no device sync
    total_labels = int(target_lengths.sum())
    # labels in [1, C-1] (0 is the blank class)
    targets = jax.random.randint(k2, (total_labels,), 1, C, dtype=jnp.int32)
    input_lengths = jnp.full((B,), T_, dtype=jnp.int32)  # unused, parity only

    loss = ace_loss_pallas(logits, targets, input_lengths, target_lengths)
    loss = jax.block_until_ready(loss)

    ref = ace_loss_ref(logits, targets, input_lengths, target_lengths)
    np.testing.assert_allclose(np.asarray(loss), np.asarray(ref),
                               rtol=1e-5, atol=1e-5)
    print("KERNEL_OK")
</pallas_src>

<mosaic_0001>
module attributes {stable_mosaic.version = 11 : i64} {
  func.func @_ace_kernel(%arg0: i32, %arg1: i32, %arg2: memref<1x16x128xf32, #tpu.memory_space<vmem>>, %arg3: memref<2x128xf32, #tpu.memory_space<vmem>>, %arg4: memref<1x1x128xf32, #tpu.memory_space<vmem>>, %arg5: memref<1x128xf32, #tpu.memory_space<vmem>>) attributes {dimension_semantics = [#tpu.dimension_semantics<parallel>, #tpu.dimension_semantics<arbitrary>], iteration_bounds = array<i64: 2, 1>, scalar_prefetch = 0 : i64, scratch_operands = 1 : i64, tpu.core_type = #tpu.core_type<tc>, window_params = [{transform_indices = @transform_0, window_bounds = array<i64: 1, 16, 128>}, {pipeline_mode = #tpu.pipeline_mode<synchronous>, transform_indices = @transform_1, window_bounds = array<i64: 2, 128>}, {transform_indices = @transform_2, window_bounds = array<i64: 1, 1, 128>}]} {
    %c0_i32 = arith.constant 0 : i32
    %0 = arith.cmpi eq, %arg1, %c0_i32 : i32
    %1 = arith.extui %0 : i1 to i32
    %c0_i32_0 = arith.constant 0 : i32
    %2 = arith.cmpi ne, %1, %c0_i32_0 : i32
    scf.if %2 {
      %cst_12 = arith.constant 0.000000e+00 : f32
      %22 = vector.broadcast %cst_12 : f32 to vector<1x128xf32>
      %c0_13 = arith.constant 0 : index
      %c0_14 = arith.constant 0 : index
      %23 = vector.load %arg5[%c0_13, %c0_14] : memref<1x128xf32, #tpu.memory_space<vmem>>, vector<1x128xf32>
      tpu.vector_store %arg5[%c0_13, %c0_14], %22 {strides = array<i32>} : memref<1x128xf32, #tpu.memory_space<vmem>>, vector<1x128xf32>,
    } else {
    }
    %c0 = arith.constant 0 : index
    %c0_1 = arith.constant 0 : index
    %c0_2 = arith.constant 0 : index
    %3 = vector.load %arg2[%c0, %c0_1, %c0_2] : memref<1x16x128xf32, #tpu.memory_space<vmem>>, vector<1x16x128xf32>
    %cst = arith.constant dense<0xFF800000> : vector<1x16xf32>
    %4 = vector.multi_reduction <maximumf>, %3, %cst [2] : vector<1x16x128xf32> to vector<1x16xf32>
    %5 = vector.shape_cast %4 : vector<1x16xf32> to vector<1x16x1xf32>
    %6 = vector.broadcast %5 : vector<1x16x1xf32> to vector<1x16x128xf32>
    %7 = arith.subf %3, %6 : vector<1x16x128xf32>
    %8 = math.exp %7 : vector<1x16x128xf32>
    %cst_3 = arith.constant dense<0.000000e+00> : vector<1x16xf32>
    %9 = vector.multi_reduction <add>, %8, %cst_3 [2] : vector<1x16x128xf32> to vector<1x16xf32>
    %10 = vector.shape_cast %9 : vector<1x16xf32> to vector<1x16x1xf32>
    %cst_4 = arith.constant 1.000000e+00 : f32
    %11 = vector.broadcast %cst_4 : f32 to vector<1x16x1xf32>
    %12 = arith.divf %11, %10 : vector<1x16x1xf32>
    %13 = vector.broadcast %12 : vector<1x16x1xf32> to vector<1x16x128xf32>
    %14 = arith.mulf %8, %13 : vector<1x16x128xf32>
    %c0_5 = arith.constant 0 : index
    %c0_6 = arith.constant 0 : index
    %15 = vector.load %arg5[%c0_5, %c0_6] : memref<1x128xf32, #tpu.memory_space<vmem>>, vector<1x128xf32>
    %cst_7 = arith.constant dense<0.000000e+00> : vector<1x128xf32>
    %16 = vector.multi_reduction <add>, %14, %cst_7 [1] : vector<1x16x128xf32> to vector<1x128xf32>
    %17 = arith.addf %15, %16 : vector<1x128xf32>
    %c0_8 = arith.constant 0 : index
    %c0_9 = arith.constant 0 : index
    %18 = vector.load %arg5[%c0_8, %c0_9] : memref<1x128xf32, #tpu.memory_space<vmem>>, vector<1x128xf32>
    tpu.vector_store %arg5[%c0_8, %c0_9], %17 {strides = array<i32>} : memref<1x128xf32, #tpu.memory_space<vmem>>, vector<1x128xf32>,
    %c0_i32_10 = arith.constant 0 : i32
    %19 = arith.cmpi eq, %arg1, %c0_i32_10 : i32
    %20 = arith.extui %19 : i1 to i32
    %c0_i32_11 = arith.constant 0 : i32
    %21 = arith.cmpi ne, %20, %c0_i32_11 : i32
    scf.if %21 {
      %c0_12 = arith.constant 0 : index
      %c0_13 = arith.constant 0 : index
      %22 = vector.load %arg5[%c0_12, %c0_13] : memref<1x128xf32, #tpu.memory_space<vmem>>, vector<1x128xf32>
      %cst_14 = arith.constant 6.250000e-02 : f32
      %23 = vector.broadcast %cst_14 : f32 to vector<1x128xf32>
      %24 = arith.mulf %22, %23 : vector<1x128xf32>
      %25 = tpu.iota {dimensions = array<i32: 1>} : vector<1x128xi32>
      %c8_i32 = arith.constant 8 : i32
      %26 = vector.broadcast %c8_i32 : i32 to vector<1x128xi32>
      %27 = arith.cmpi slt, %25, %26 : vector<1x128xi32>
      %cst_15 = arith.constant 1.000000e+00 : f32
      %28 = vector.broadcast %cst_15 : f32 to vector<1x128xf32>
      %29 = arith.select %27, %24, %28 : vector<1x128xi1>, vector<1x128xf32>
      %30 = math.log %29 : vector<1x128xf32>
      %31 = arith.index_cast %arg0 : i32 to index
      %c0_16 = arith.constant 0 : index
      %32 = vector.load %arg3[%31, %c0_16] : memref<2x128xf32, #tpu.memory_space<vmem>>, vector<1x128xf32>
      %33 = arith.mulf %30, %32 : vector<1x128xf32>
      %34 = vector.shape_cast %33 : vector<1x128xf32> to vector<1x1x128xf32>
      %cst_17 = arith.constant dense<0.000000e+00> : vector<1xf32>
      %35 = vector.multi_reduction <add>, %34, %cst_17 [1, 2] : vector<1x1x128xf32> to vector<1xf32>
      %36 = vector.shape_cast %35 : vector<1xf32> to vector<1x1x1xf32>
      %37 = vector.extract %36[0, 0, 0] : f32 from vector<1x1x1xf32>
      %cst_18 = arith.constant 0.000000e+00 : f32
      %38 = arith.subf %cst_18, %37 : f32
      %39 = vector.broadcast %38 : f32 to vector<1x1x128xf32>
      %c0_19 = arith.constant 0 : index
      %c0_20 = arith.constant 0 : index
      %c0_21 = arith.constant 0 : index
      %40 = vector.load %arg4[%c0_19, %c0_20, %c0_21] : memref<1x1x128xf32, #tpu.memory_space<vmem>>, vector<1x1x128xf32>
      tpu.vector_store %arg4[%c0_19, %c0_20, %c0_21], %39 {strides = array<i32>} : memref<1x1x128xf32, #tpu.memory_space<vmem>>, vector<1x1x128xf32>,
    } else {
    }
    return
  }
  func.func @transform_0(%arg0: i32, %arg1: i32) -> (i32, i32, i32) {
    %c0_i32 = arith.constant 0 : i32
    %c0_i32_0 = arith.constant 0 : i32
    return %arg0, %arg1, %c0_i32 : i32, i32, i32
  }
  func.func @transform_1(%arg0: i32, %arg1: i32) -> (i32, i32) {
    %c0_i32 = arith.constant 0 : i32
    %c0_i32_0 = arith.constant 0 : i32
    %c0_i32_1 = arith.constant 0 : i32
    return %c0_i32, %c0_i32_0 : i32, i32
  }
  func.func @transform_2(%arg0: i32, %arg1: i32) -> (i32, i32, i32) {
    %c0_i32 = arith.constant 0 : i32
    %c0_i32_0 = arith.constant 0 : i32
    %c0_i32_1 = arith.constant 0 : i32
    return %arg0, %c0_i32, %c0_i32_0 : i32, i32, i32
  }
}

</mosaic_0001>

<bundles_post_ra>
// kernel: tpu_custom_call.1
= control target key start
LH: loop header
LB: loop body
LE: loop exit
PB: predicated region body
PF: predicated region fallthrough
CT: control target
= control target key end

     0   :  { %7 = vsyncpa [#allocation4], 0  ;;  %s736_s0 = inlined_call_operand.hbm [shape: f32[2,16,128], index: 0, kind: input, shape index: {}]   ;;  %s737_s1 = inlined_call_operand.vmem [shape: f32[2,128], index: 1, kind: input, shape index: {}]   ;;  %s738_s2 = inlined_call_operand.hbm [shape: f32[2,1,128], index: 2, kind: output, shape index: {}]  }
   0x1   :  { %9 = vsyncpa [#allocation4 + $0x1], 0 }
   0x2   :  { %10 = vsyncpa [#allocation5], 0 }
   0x3   :  { %12 = vsyncpa [#allocation5 + $0x1], 0  ;;  %s558_s9 = smov 0   ;;  %s560_s10 = smov 0  }
   0x4   :  { %s562_s11 = smov 0   ;;  %s564_s12 = smov 0  }
   0x5   :  { %s566_s13 = smov 0   ;;  %s568_s14 = smov 0  }
   0x6 LB: > { %s334_s15 = sadd.s32 4294967295, %s536_s14   ;;  %s335_s16 = sadd.s32 4294967294, %s536_s14   ;;  %s536_s14 = sphi %s568_s14, %s18_s14   ;;  %s532_s13 = sphi %s566_s13, %s753_s13   ;;  %s528_s12 = sphi %s564_s12, %s752_s12   ;;  %s524_s11 = sphi %s562_s11, %s751_s11   ;;  %s520_s10 = sphi %s560_s10, %s750_s10   ;;  %s516_s9 = sphi %s558_s9, %s749_s9  }
   0x7   : > { %s30_s17 = sadd.s32 1, %s532_s13  ;;  %s39_s18 = sadd.s32 1, %s524_s11 }
   0x8   : > { %p32_p0 = scmp.ge.s32.totalorder %s30_s17, 2  ;;  %p46_p1 = scmp.ne.s32.totalorder %s524_s11, %s520_s10 }
   0x9   : > { %p47_p2 = scmp.eq.s32.totalorder %s536_s14, 0  ;;  %p52_p3 = scmp.ne.s32.totalorder %s520_s10, %s516_s9 }
   0xa   : > { %s755_s17 = smov (%p32_p0, %s30_s17), 0  ;;  %p53_p5 = scmp.eq.s32.totalorder %s334_s15, 0 }
   0xb   : > { %p599_p4 = por %p47_p2, %p46_p1  ;;  %s34_s20 = ssub.s32 %s532_s13, %s755_s17 }
   0xc   : > { %p97_p6 = scmp.eq.s32.totalorder %s334_s15, 1  ;;  %p37_p7 = scmp.eq.s32.totalorder %s34_s20, 0 }
   0xd   : > { %p605_p8 = por %p53_p5, %p52_p3  ;;  %p103_p10 = scmp.eq.s32.totalorder %s335_s16, 1 }
   0xe   : > { %p609_p9 = por %p97_p6, %p46_p1  ;;  %p361_p13 = scmp.lt.s32.totalorder %s536_s14, 2 }
   0xf   : > { %s614_s23 = scalar_select %p37_p7, %s524_s11, %s39_s18  }
  0x10   : > { %s742_s22 = scalar_select %p609_p9, 1, 0 }
  0x11   : > { %p616_p11 = por %p103_p10, %p52_p3  ;;  %s126_s25 = sand.u32 1, %s524_s11  }
  0x12   : > { %s338_s26 = sshll.u32 %s126_s25, 4  ;;  %s346_s27 = sshll.u32 %s532_s13, 8 }
  0x13   : > { %s743_s24 = scalar_select %p616_p11, 1, 0 }
  0x14   : > { %s627_s30 = scalar_lea.hbm %s736_s0, %s346_s27  ;;  %s130_s3 = scalar_lea.vmem [#allocation3], %s338_s26 }
  0x15   : > { %s139_s4 = sshll.u32 %s130_s3, 4  ;;  %p633_p0 = pnand %p361_p13, %p599_p4  ;;  %s629_s4 = int_to_ptr.vmem [resolvable:$true] %s139_s4 }
  0x16   : > { %s638_s6 = scalar_lea.sflag [#allocation4], %s126_s25  ;;  %s424_s7 = scalar_lea.hbm %s627_s30, 256 }
  0x17   : > { %p425_p2 = scmp.ne.s32.totalorder %s627_s30, %s424_s7  ;;  %p426_p3 = pneg %p633_p0 }
  0x18   : > { %s429_s16 = scalar_lea.hbm %s736_s0, 512  ;;  %p430_p4 = scmp.lt.u32.totalorder %s627_s30, %s736_s0 }
  0x19   : > { %p427_p5 = pnand %p426_p3, %p425_p2  ;;  %p431_p7 = scmp.lt.u32.totalorder %s429_s16, %s424_s7 }
  0x1a   : > { %p433_p13 = scmp.lt.u32.totalorder %s424_s7, %s627_s30 }
  0x1b   : > { %p428_p6 = pneg %p427_p5  ;;  %p432_p10 = por %p431_p7, %p430_p4 }
  0x1d   : > { %p434_p12 = por %p433_p13, %p432_p10 }
  0x1f   : > { %p435_p1 = pnand %p434_p12, %p428_p6 }
  0x21   : > { %438 = shalt.err (!%p435_p1)
}
  0x22   : > { %s439_s20 = scalar_lea.vmem %s629_s4, 256  ;;  %s538_s25 = smov [#allocation3]  }
  0x23   : > { %p440_p2 = scmp.ne.s32.totalorder %s629_s4, %s439_s20  ;;  %s444_s26 = sshll.u32 %s538_s25, 4  ;;  %s445_s26 = int_to_ptr.vmem [resolvable:$false] %s444_s26 }
  0x24   : > { %s446_s27 = scalar_lea.vmem %s445_s26, 512  ;;  %p447_p9 = scmp.lt.s32.totalorder %s629_s4, %s445_s26 }
  0x25   : > { %p442_p5 = pnand %p440_p2, %p426_p3  ;;  %p448_p4 = scmp.lt.s32.totalorder %s446_s27, %s439_s20 }
  0x27   : > { %p443_p11 = pneg %p442_p5  ;;  %p449_p7 = por %p448_p4, %p447_p9 }
  0x29   : > { %p450_p10 = pnand %p449_p7, %p443_p11 }
  0x2b   : > { %453 = shalt.err (!%p450_p10)
}
  0x2c   : > { %s539_s28 = smov 128   ;;  %s540_s29 = smov 8  }
  0x2d   : > { %356 = dma.hbm_to_vmem [thread:$0]  (!%p633_p0), %s627_s30, 256, %s629_s4, %s638_s6, %s539_s28, %s539_s28, %s540_s29  }
  0x2e   : > { %p147_p12 = scmp.lt.s32.totalorder %s536_s14, 3  ;;  %p745_p1 = scmp.ge.s32.totalorder %s536_s14, 1 }
  0x30   : > { %p148_p3 = pnand %p745_p1, %p147_p12 }
  0x31   : > { %s670_s3 = sand.u32 (!%p148_p3), 1, %s520_s10  }
  0x32   : > { %151 = sbr.rel (%p148_p3) target bundleno = 639 (0x27f), region = 28  ;;  %s342_s7 = sshll.u32 (!%p148_p3), %s670_s3, 4 }
  0x33   : > { %s154_s8 = scalar_lea.sflag (!%p148_p3), [#allocation4], %s670_s3  ;;  %s157_s15 = scalar_lea.vmem (!%p148_p3), [#allocation3], %s342_s7 }
  0x39   : > { %507 = dma.done.wait (%p605_p8), %s154_s8, 256  }
  0x3a   : > { %509 = vsyncadd (%p605_p8), %s154_s8, 4294967040  ;;  %v541_v0 = vmov 0.0   ;;  %v183_v1 = vld [vmem:[%s157_s15] sm:$0xff]  ;;  %v184_v2 = vld [vmem:[%s157_s15 + $0x8] sm:$0xff]  ;;  %v220_v26 = vlaneseq  ;;  %s226_s4 = scalar_lea.vmem %s737_s1, %s528_s12  ;;  %vm229_vm1 = vcmask 1040384   ;;  %s176_s5 = scalar_lea.vmem [#allocation6], %s670_s3 }
  0x3b   : > { %182 = vst [vmem:[#allocation2] sm:$0x1] %v541_v0  ;;  %185 = vmax.xlane.f32.xlu0 %v183_v1  ;;  %v227_v32 = vld [vmem:[%s226_s4] sm:$0x1]  ;;  %s256_s6 = sshll.u32 %s176_s5, 4  ;;  %s343_s16 = sshll.u32 %s528_s12, 4  ;;  %s689_s6 = int_to_ptr.vmem [resolvable:$true] %s256_s6 }
  0x3c   : > { %v221_v27 = vand.u32 127, %v220_v26  ;;  %s687_s26 = scalar_lea.hbm %s738_s2, %s343_s16  ;;  %s244_s27 = scalar_lea.sflag [#allocation5], %s670_s3 }
  0x3d   : > { %s454_s28 = scalar_lea.vmem %s689_s6, 16  ;;  %p746_p9 = scmp.ne.s32.totalorder %s742_s22, 0 }
  0x3e   : > { %vm222_vm0 = vcmp.lt.s32.totalorder %v221_v27, 8  ;;  %p455_p8 = scmp.ne.s32.totalorder %s689_s6, %s454_s28  ;;  %s542_s12 = smov [#allocation6]  }
  0x3f   : > { %187 = vmax.xlane.f32.xlu0 %v184_v2  ;;  %s458_s29 = sshll.u32 %s542_s12, 4  ;;  %s459_s29 = int_to_ptr.vmem [resolvable:$false] %s458_s29 }
  0x40   : > { %p456_p11 = pnand %p455_p8, %p746_p9  ;;  %s460_s7 = scalar_lea.vmem %s459_s29, 32 }
  0x41   : > { %p461_p6 = scmp.lt.s32.totalorder %s689_s6, %s459_s29  ;;  %p462_p13 = scmp.lt.s32.totalorder %s460_s7, %s454_s28 }
  0x42   : > { %v205_v23 = vld [vmem:[#allocation2] sm:$0x1]  ;;  %p457_p0 = pneg %p456_p11 }
  0x43   : > { %p463_p2 = por %p462_p13, %p461_p6 }
  0x45   : > { %p464_p5 = pnand %p463_p2, %p457_p0 }
  0xc8   : > { %v186_v3 = vpop.xlane.xlu0 %185 }
  0xc9   : > { %v189_v4 = vsub.f32 %v183_v1, %v186_v3 }
  0xcb   : > { %v191_v5 = vmul.f32 1.442695, %v189_v4 }
  0xcc   : > { %v188_v6 = vpop.xlane.xlu0 %187 }
  0xcd   : > { %414 = vpow2.f32 %v191_v5  ;;  %v190_v7 = vsub.f32 %v184_v2, %v188_v6 }
  0xcf   : > { %v193_v8 = vmul.f32 1.442695, %v190_v7 }
  0xd1   : > { %416 = vpow2.f32 %v193_v8 }
  0xd7   : > { %v415_v9 = vpop.eup %414 }
  0xd8   : > { %195 = vadd.xlane.f32.xlu1 %v415_v9 }
  0xdb   : > { %v417_v10 = vpop.eup %416 }
  0xdc   : > { %197 = vadd.xlane.f32.xlu1 %v417_v10 }
 0x165   : > { %v196_v11 = vpop.xlane.xlu1 %195 }
 0x166   : > { %418 = vrcp.f32 %v196_v11 }
 0x169   : > { %v198_v12 = vpop.xlane.xlu1 %197 }
 0x16a   : > { %420 = vrcp.f32 %v198_v12 }
 0x170   : > { %v419_v13 = vpop.eup %418 }
 0x171   : > { %v203_v15 = vmul.f32 %v419_v13, %v415_v9 }
 0x174   : > { %v421_v14 = vpop.eup %420 }
 0x175   : > { %v204_v16 = vmul.f32 %v421_v14, %v417_v10 }
 0x177   : > { %v206_v17 = vadd.f32 %v204_v16, %v203_v15 }
 0x179   : > { %v207_v18 = vrot.slane %v206_v17, 4 }
 0x17b   : > { %v208_v19 = vadd.f32 %v207_v18, %v206_v17 }
 0x17d   : > { %v209_v20 = vrot.slane %v208_v19, 2 }
 0x17f   : > { %v210_v21 = vadd.f32 %v209_v20, %v208_v19 }
 0x181   : > { %v211_v22 = vrot.slane %v210_v21, 1 }
 0x183   : > { %v212_v24 = vadd.f32 %v211_v22, %v210_v21 }
 0x185   : > { %v213_v25 = vadd.f32 %v212_v24, %v205_v23 }
 0x187   : > { %214 = vst [vmem:[#allocation2] sm:$0x1] %v213_v25 }
 0x18e   : > { %v218_v28 = vld [vmem:[#allocation2] sm:$0x1] }
 0x18f   : > { %v219_v29 = vmul.f32 0.0625, %v218_v28 }
 0x191   : > { %v223_v30 = vsel %vm222_vm0, %v219_v29, 1.0 }
 0x192   : > { %422 = vlog2.f32 %v223_v30 }
 0x19c   : > { %v423_v31 = vpop.eup %422 }
 0x19d   : > { %v225_v33 = vmul.f32 0.6931472, %v423_v31 }
 0x19f   : > { %v228_v34 = vmul.f32 %v227_v32, %v225_v33 }
 0x1a1   : > { %v230_v35 = vsel %vm229_vm1, %v228_v34, 0.0 }
 0x1a2   : > { %231 = vadd.xlane.f32.xlu0 %v230_v35 }
 0x22f   : > { %v232_v36 = vpop.xlane.xlu0 %231 }
 0x230   : > { %v233_v37 = vrot.slane %v232_v36, 4 }
 0x232   : > { %v234_v38 = vadd.f32 %v233_v37, %v232_v36 }
 0x234   : > { %v235_v39 = vrot.slane %v234_v38, 2 }
 0x236   : > { %v236_v40 = vadd.f32 %v235_v39, %v234_v38 }
 0x238   : > { %v237_v41 = vrot.slane %v236_v40, 1 }
 0x23a   : > { %v238_v42 = vadd.f32 %v237_v41, %v236_v40 }
 0x23c   : > { %347 = vpush %v238_v42 }
 0x26d   : > { %s348_s18 = spop %347 }
 0x26e   : > { %s240_s19 = ssub.f32 0.0, %s348_s18 }
 0x270   : > { %v241_v43 = vstv %s240_s19 }
 0x271   : > { %242 = vst [vmem:[%s176_s5] sm:$0x1] %v241_v43 }
 0x272   : > { %467 = shalt.err (!%p464_p5)
}
 0x273   : > { %s468_s3 = scalar_lea.hbm %s687_s26, 16  ;;  %s472_s21 = scalar_lea.hbm %s738_s2, 32 }
 0x274   : > { %p469_p4 = scmp.ne.s32.totalorder %s687_s26, %s468_s3  ;;  %p473_p12 = scmp.lt.u32.totalorder %s687_s26, %s738_s2 }
 0x275   : > { %p474_p1 = scmp.lt.u32.totalorder %s472_s21, %s468_s3  ;;  %p476_p8 = scmp.lt.u32.totalorder %s468_s3, %s687_s26 }
 0x276   : > { %p470_p7 = pnand %p469_p4, %p746_p9 }
 0x277   : > { %p475_p3 = por %p474_p1, %p473_p12 }
 0x278   : > { %p471_p10 = pneg %p470_p7 }
 0x279   : > { %p477_p11 = por %p476_p8, %p475_p3 }
 0x27b   : > { %p478_p0 = pnand %p477_p11, %p471_p10 }
 0x27d   : > { %481 = shalt.err (!%p478_p0)
}
 0x27e   : > { %351 = dma.vmem_to_hbm [thread:$0]  (%p746_p9), %s689_s6, 16, %s687_s26, %s244_s27  }
 0x27f PF: > { %s268_s5 = sand.u32 1, %s516_s9   ;;  %p747_p6 = scmp.ne.s32.totalorder %s743_s24, 0 }
 0x280   : > { %p748_p13 = scmp.ge.s32.totalorder %s536_s14, 2  ;;  %s269_s16 = scalar_lea.sflag [#allocation5], %s268_s5 }
 0x282   : > { %p358_p2 = pnand %p748_p13, %p747_p6 }
 0x284   : > { %511 = dma.done.wait (!%p358_p2), %s269_s16, 16  }
 0x285   : > { %513 = vsyncadd (!%p358_p2), %s269_s16, 4294967280  ;;  %s18_s14 = sadd.s32 1, %s536_s14   ;;  %s749_s9 = smov %s520_s10 }
 0x286   : > { %p15_p5 = scmp.ge.s32.totalorder %s18_s14, 4   ;;  %s750_s10 = smov %s524_s11 }
 0x287   : > { %s751_s11 = smov %s614_s23  ;;  %s752_s12 = smov %s532_s13 }
 0x288   : > { %s753_s13 = smov %s755_s17  ;;  %17 = sbr.rel (!%p15_p5) target bundleno = 6 (0x6), region = 82 }
 0x28f   :  { %273 = vsyncpa [#allocation4], 1 }
 0x290   :  { %275 = vsyncpa [#allocation4 + $0x1], 1 }
 0x291   :  { %276 = vsyncpa [#allocation5], 1 }
 0x292   :  { %278 = vsyncpa [#allocation5 + $0x1], 1 }

</bundles_post_ra>
